<compile_context>
chip_gen: v7x
topology: tpu7x:2x2x1
jax: 0.10.0
libtpu: 0.0.40
codegen_flags: <defaults>
</compile_context>

<pallas_src>
import functools

import jax
import jax.numpy as jnp
from jax.experimental import pallas as pl
from jax.experimental.pallas import tpu as pltpu


def _round_up(n, m):
    return ((n + m - 1) // m) * m


def lora_kernel(x_ref, w1_ref, w2_ref, b2_ref, o_ref):
    # x_ref: (tm, in_size)   w1_ref: (in_size, kp)   w2_ref: (kp, out_size)
    # b2_ref: (1, out_size)  o_ref: (tm, out_size)
    x = x_ref[...]
    # in_size -> kp (rank, zero-padded to lane width). MXU runs in the stored
    # dtype; accumulation is f32.
    h = jnp.dot(x, w1_ref[...], preferred_element_type=jnp.float32)
    # kp -> out_size (+ bias). Cast the tiny (tm, kp) intermediate to the
    # weight dtype rather than upcasting the resident weight every step.
    h = h.astype(w2_ref.dtype)
    out = jnp.dot(h, w2_ref[...], preferred_element_type=jnp.float32)
    out = out + b2_ref[...].astype(jnp.float32)
    o_ref[...] = out.astype(o_ref.dtype)


# Target ~40 MiB of scoped VMEM; request 48 MiB from the compiler, which is
# within physical VMEM on every generation (v7x: 64 MiB per TensorCore).
_VMEM_BUDGET_BYTES = 40 * 1024 * 1024
_VMEM_LIMIT_BYTES = 48 * 1024 * 1024


def _choose_tm(m_rows, in_size, out_size, kp, x_bytes, w_bytes, budget):
    """Largest row tile whose double-buffered x/out tiles + resident weights
    fit the VMEM budget, capped at 512 rows (safe on v5e/v6e/v7x)."""
    weight_bytes = (in_size * kp + kp * out_size + out_size) * w_bytes
    per_row_bytes = 2 * (in_size + out_size) * x_bytes  # double-buffered x+out
    avail = max(budget - 2 * weight_bytes, 8 * per_row_bytes)
    tm = int(avail // per_row_bytes)
    tm = max(8, min(512, (tm // 8) * 8))
    tm = min(tm, _round_up(m_rows, 8))
    return max(8, (tm // 8) * 8)


@functools.partial(jax.jit, static_argnames=("tm",))
def lora_forward(x, w1, w2, b2, *, tm=None):
    """LoRA forward.

    x:  (..., in_size)
    w1: (in_size, k)   == in_to_k.weight.T   (no bias)
    w2: (k, out_size)  == k_to_out.weight.T
    b2: (out_size,)    == k_to_out.bias
    returns (..., out_size)
    """
    *lead, in_size = x.shape
    k, out_size = w2.shape
    assert w1.shape == (in_size, k)

    M = 1
    for d in lead:
        M *= d
    x2d = x.reshape(M, in_size)

    # Pad the LoRA rank to a lane-aligned width (k=50 -> 128). Zero columns of
    # w1 / zero rows of w2 are numerically inert but give clean MXU tiles.
    kp = _round_up(k, 128)
    if kp != k:
        w1 = jnp.pad(w1, ((0, 0), (0, kp - k)))
        w2 = jnp.pad(w2, ((0, kp - k), (0, 0)))
    b2_2d = b2.reshape(1, out_size)

    x_bytes = x.dtype.itemsize
    w_bytes = w1.dtype.itemsize
    if tm is None:
        tm = _choose_tm(M, in_size, out_size, kp, x_bytes, w_bytes,
                        _VMEM_BUDGET_BYTES)
    tm = max(8, (min(tm, _round_up(M, 8)) // 8) * 8)

    # Pad the token dim to a tile multiple (padded rows produce bias-only rows
    # that are sliced away afterwards) — no divisibility assert.
    Mp = _round_up(M, tm)
    if Mp != M:
        x2d = jnp.pad(x2d, ((0, Mp - M), (0, 0)))

    flops = 2 * Mp * (in_size * kp + kp * out_size)
    bytes_accessed = (Mp * (in_size + out_size) * x_bytes
                      + (in_size * kp + kp * out_size + out_size) * w_bytes)

    out2d = pl.pallas_call(
        lora_kernel,
        out_shape=jax.ShapeDtypeStruct((Mp, out_size), x.dtype),
        grid_spec=pltpu.PrefetchScalarGridSpec(
            num_scalar_prefetch=0,
            grid=(Mp // tm,),
            in_specs=[
                pl.BlockSpec((tm, in_size), lambda i: (i, 0)),
                pl.BlockSpec((in_size, kp), lambda i: (0, 0)),   # grid-resident
                pl.BlockSpec((kp, out_size), lambda i: (0, 0)),  # grid-resident
                pl.BlockSpec((1, out_size), lambda i: (0, 0)),   # grid-resident
            ],
            out_specs=pl.BlockSpec((tm, out_size), lambda i: (i, 0)),
        ),
        compiler_params=pltpu.CompilerParams(
            dimension_semantics=("parallel",),
            vmem_limit_bytes=_VMEM_LIMIT_BYTES,
        ),
        cost_estimate=pl.CostEstimate(
            flops=flops, transcendentals=0, bytes_accessed=bytes_accessed),
    )(x2d, w1, w2, b2_2d)

    return out2d[:M].reshape(*lead, out_size)


def reference(x, w1, w2, b2):
    xf = x.astype(jnp.float32)
    h = xf @ w1.astype(jnp.float32)
    y = h @ w2.astype(jnp.float32) + b2.astype(jnp.float32)
    return y.astype(x.dtype)


if __name__ == "__main__":
    # Small shapes consistent with the module (full scale: in_size=4096,
    # out_size=2048, k=50); scaled down for the demo.
    batch, seq = 2, 8
    in_size, out_size, k = 256, 128, 50

    key = jax.random.PRNGKey(0)
    k_x, k_w1, k_w2, k_b2 = jax.random.split(key, 4)

    x = jax.random.normal(k_x, (batch, seq, in_size), jnp.float32)
    # Deterministic synthetic parameters (pre-transposed PyTorch Linear
    # weights): in_to_k.weight.T -> (in_size, k);
    # k_to_out.weight.T -> (k, out_size), k_to_out.bias -> (out_size,).
    w1 = jax.random.normal(k_w1, (in_size, k), jnp.float32) / jnp.sqrt(in_size)
    w2 = jax.random.normal(k_w2, (k, out_size), jnp.float32) / jnp.sqrt(k)
    b2 = jax.random.normal(k_b2, (out_size,), jnp.float32) * 0.01

    out = lora_forward(x, w1, w2, b2)
    jax.block_until_ready(out)

    ref = reference(x, w1, w2, b2)
    assert out.shape == (batch, seq, out_size)
    assert jnp.allclose(out, ref, atol=1e-4, rtol=1e-4), "mismatch vs reference"

    print("KERNEL_OK")
</pallas_src>

<mosaic_0001>
module attributes {stable_mosaic.version = 11 : i64} {
  func.func @lora_kernel(%arg0: i32, %arg1: memref<16x256xf32, #tpu.memory_space<vmem>>, %arg2: memref<256x128xf32, #tpu.memory_space<vmem>>, %arg3: memref<128x128xf32, #tpu.memory_space<vmem>>, %arg4: memref<1x128xf32, #tpu.memory_space<vmem>>, %arg5: memref<16x128xf32, #tpu.memory_space<vmem>>) attributes {dimension_semantics = [#tpu.dimension_semantics<parallel>], iteration_bounds = array<i64: 1>, scalar_prefetch = 0 : i64, scratch_operands = 0 : i64, tpu.core_type = #tpu.core_type<tc>, window_params = [{transform_indices = @transform_0, window_bounds = array<i64: 16, 256>}, {pipeline_mode = #tpu.pipeline_mode<synchronous>, transform_indices = @transform_1, window_bounds = array<i64: 256, 128>}, {pipeline_mode = #tpu.pipeline_mode<synchronous>, transform_indices = @transform_2, window_bounds = array<i64: 128, 128>}, {pipeline_mode = #tpu.pipeline_mode<synchronous>, transform_indices = @transform_3, window_bounds = array<i64: 1, 128>}, {transform_indices = @transform_4, window_bounds = array<i64: 16, 128>}]} {
    %c0 = arith.constant 0 : index
    %c0_0 = arith.constant 0 : index
    %0 = vector.load %arg1[%c0, %c0_0] : memref<16x256xf32, #tpu.memory_space<vmem>>, vector<16x256xf32>
    %c0_1 = arith.constant 0 : index
    %c0_2 = arith.constant 0 : index
    %1 = vector.load %arg2[%c0_1, %c0_2] : memref<256x128xf32, #tpu.memory_space<vmem>>, vector<256x128xf32>
    %cst = arith.constant dense<0.000000e+00> : vector<16x128xf32>
    %2 = tpu.matmul %0, %1, %cst {dimension_numbers = #tpu.dot_dimension_numbers<[1], [0], [0], [1], [0, 0, 1, 1], [], []>} : vector<16x256xf32>, vector<256x128xf32>, vector<16x128xf32> -> vector<16x128xf32>
    %c0_3 = arith.constant 0 : index
    %c0_4 = arith.constant 0 : index
    %3 = vector.load %arg3[%c0_3, %c0_4] : memref<128x128xf32, #tpu.memory_space<vmem>>, vector<128x128xf32>
    %cst_5 = arith.constant dense<0.000000e+00> : vector<16x128xf32>
    %4 = tpu.matmul %2, %3, %cst_5 {dimension_numbers = #tpu.dot_dimension_numbers<[1], [0], [0], [1], [0, 0, 1, 1], [], []>} : vector<16x128xf32>, vector<128x128xf32>, vector<16x128xf32> -> vector<16x128xf32>
    %c0_6 = arith.constant 0 : index
    %c0_7 = arith.constant 0 : index
    %5 = vector.load %arg4[%c0_6, %c0_7] : memref<1x128xf32, #tpu.memory_space<vmem>>, vector<1x128xf32>
    %6 = vector.broadcast %5 : vector<1x128xf32> to vector<16x128xf32>
    %7 = arith.addf %4, %6 : vector<16x128xf32>
    %c0_8 = arith.constant 0 : index
    %c0_9 = arith.constant 0 : index
    %8 = vector.load %arg5[%c0_8, %c0_9] : memref<16x128xf32, #tpu.memory_space<vmem>>, vector<16x128xf32>
    tpu.vector_store %arg5[%c0_8, %c0_9], %7 {strides = array<i32>} : memref<16x128xf32, #tpu.memory_space<vmem>>, vector<16x128xf32>,
    return
  }
  func.func @transform_0(%arg0: i32) -> (i32, i32) {
    %c0_i32 = arith.constant 0 : i32
    %c0_i32_0 = arith.constant 0 : i32
    return %arg0, %c0_i32 : i32, i32
  }
  func.func @transform_1(%arg0: i32) -> (i32, i32) {
    %c0_i32 = arith.constant 0 : i32
    %c0_i32_0 = arith.constant 0 : i32
    %c0_i32_1 = arith.constant 0 : i32
    return %c0_i32, %c0_i32_0 : i32, i32
  }
  func.func @transform_2(%arg0: i32) -> (i32, i32) {
    %c0_i32 = arith.constant 0 : i32
    %c0_i32_0 = arith.constant 0 : i32
    %c0_i32_1 = arith.constant 0 : i32
    return %c0_i32, %c0_i32_0 : i32, i32
  }
  func.func @transform_3(%arg0: i32) -> (i32, i32) {
    %c0_i32 = arith.constant 0 : i32
    %c0_i32_0 = arith.constant 0 : i32
    %c0_i32_1 = arith.constant 0 : i32
    return %c0_i32, %c0_i32_0 : i32, i32
  }
  func.func @transform_4(%arg0: i32) -> (i32, i32) {
    %c0_i32 = arith.constant 0 : i32
    %c0_i32_0 = arith.constant 0 : i32
    return %arg0, %c0_i32 : i32, i32
  }
}

</mosaic_0001>

<bundles_post_ra>
// kernel: lora_forward.1
= control target key start
LH: loop header
LB: loop body
LE: loop exit
PB: predicated region body
PF: predicated region fallthrough
CT: control target
= control target key end

     0   :  { %s627_s0 = inlined_call_operand.vmem [shape: f32[16,256], index: 0, kind: input, shape index: {}]   ;;  %s628_s1 = inlined_call_operand.vmem [shape: f32[256,128], index: 1, kind: input, shape index: {}]   ;;  %s629_s2 = inlined_call_operand.vmem [shape: f32[128,128], index: 2, kind: input, shape index: {}]   ;;  %s630_s3 = inlined_call_operand.vmem [shape: f32[1,128], index: 3, kind: input, shape index: {}]   ;;  %s631_s4 = inlined_call_operand.hbm [shape: f32[16,128], index: 4, kind: output, shape index: {}]  }
   0x1   :  { %v38_v0 = vld [vmem:[%s628_s1 + $0x80] sm:$0xff]  ;;  %v39_v1 = vld [vmem:[%s628_s1 + $0x88] sm:$0xff]  ;;  %v40_v5 = vld [vmem:[%s628_s1 + $0x90] sm:$0xff] }
   0x2   :  { %v22_v2 = vld [vmem:[%s628_s1] sm:$0xff]  ;;  %v337_v3 = vpack.c.bf16 %v39_v1, %v38_v0  ;;  %v23_v4 = vld [vmem:[%s628_s1 + $0x8] sm:$0xff]  ;;  %v41_v6 = vld [vmem:[%s628_s1 + $0x98] sm:$0xff] }
   0x3   :  { %v339_v7 = vpack.c.bf16 %v23_v4, %v22_v2  ;;  %v341_v8 = vpack.c.bf16 %v41_v6, %v40_v5  ;;  %v24_v9 = vld [vmem:[%s628_s1 + $0x10] sm:$0xff]  ;;  %v25_v10 = vld [vmem:[%s628_s1 + $0x18] sm:$0xff]  ;;  %v42_v11 = vld [vmem:[%s628_s1 + $0xa0] sm:$0xff] }
   0x4   :  { %338 = vmatprep.subr.bf16.mxu0 %v337_v3  ;;  %v43_v12 = vld [vmem:[%s628_s1 + $0xa8] sm:$0xff]  ;;  %v343_v13 = vpack.c.bf16 %v25_v10, %v24_v9  ;;  %v26_v15 = vld [vmem:[%s628_s1 + $0x20] sm:$0xff]  ;;  %v44_v17 = vld [vmem:[%s628_s1 + $0xb0] sm:$0xff] }
   0x5   :  { %340 = vmatpush3.bf16.msra.mxu0 %v339_v7  ;;  %v345_v14 = vpack.c.bf16 %v43_v12, %v42_v11  ;;  %v27_v16 = vld [vmem:[%s628_s1 + $0x28] sm:$0xff]  ;;  %v45_v18 = vld [vmem:[%s628_s1 + $0xb8] sm:$0xff]  ;;  %v28_v21 = vld [vmem:[%s628_s1 + $0x30] sm:$0xff] }
   0x6   :  { %342 = vmatprep.subr.bf16.mxu0 %v341_v8  ;;  %v347_v19 = vpack.c.bf16 %v27_v16, %v26_v15  ;;  %v349_v20 = vpack.c.bf16 %v45_v18, %v44_v17  ;;  %v29_v22 = vld [vmem:[%s628_s1 + $0x38] sm:$0xff]  ;;  %v46_v23 = vld [vmem:[%s628_s1 + $0xc0] sm:$0xff]  ;;  %v47_v24 = vld [vmem:[%s628_s1 + $0xc8] sm:$0xff] }
   0x7   :  { %v19_v25 = vld [vmem:[%s627_s0 + $0x8] sm:$0xff]  ;;  %v30_v26 = vld [vmem:[%s628_s1 + $0x40] sm:$0xff]  ;;  %v351_v27 = vpack.c.bf16 %v29_v22, %v28_v21  ;;  %v131_v30 = vld [vmem:[%s629_s2 + $0x10] sm:$0xff]  ;;  %v353_v31 = vpack.c.bf16 %v47_v24, %v46_v23 }
   0x8   :  { %118 = vmatprep.mubr.f32.mxu0 %v19_v25  ;;  %v129_v28 = vld [vmem:[%s629_s2] sm:$0xff]  ;;  %v130_v29 = vld [vmem:[%s629_s2 + $0x8] sm:$0xff]  ;;  %v48_v33 = vld [vmem:[%s628_s1 + $0xd0] sm:$0xff] }
   0x9   :  { %344 = vmatpush3.bf16.msra.mxu0 %v343_v13  ;;  %v31_v32 = vld [vmem:[%s628_s1 + $0x48] sm:$0xff]  ;;  %v369_v34 = vpack.c.bf16 %v130_v29, %v129_v28  ;;  %v132_v35 = vld [vmem:[%s629_s2 + $0x18] sm:$0xff]  ;;  %v133_v38 = vld [vmem:[%s629_s2 + $0x20] sm:$0xff] }
   0xa   :  { %346 = vmatprep.subr.bf16.mxu0 %v345_v14  ;;  %v49_v36 = vld [vmem:[%s628_s1 + $0xd8] sm:$0xff]  ;;  %v373_v37 = vpack.c.bf16 %v132_v35, %v131_v30  ;;  %v134_v39 = vld [vmem:[%s629_s2 + $0x28] sm:$0xff]  ;;  %v355_v40 = vpack.c.bf16 %v31_v32, %v30_v26 }
   0xb   :  { %370 = vmatprep.subr.bf16.mxu1 %v369_v34 }
   0xc   :  { %372 = vmatpush3.bf16.msra.mxu1 %v369_v34 }
   0xd   :  { %348 = vmatpush3.bf16.msra.mxu0 %v347_v19 }
   0xe   :  { %350 = vmatprep.subr.bf16.mxu0 %v349_v20 }
  0x11   :  { %352 = vmatpush3.bf16.msra.mxu0 %v351_v27 }
  0x12   :  { %9 = vsyncpa [#allocation3], 0  ;;  %354 = vmatprep.subr.bf16.mxu0 %v353_v31  ;;  %v357_v41 = vpack.c.bf16 %v49_v36, %v48_v33  ;;  %v32_v42 = vld [vmem:[%s628_s1 + $0x50] sm:$0xff]  ;;  %v33_v43 = vld [vmem:[%s628_s1 + $0x58] sm:$0xff]  ;;  %374 = vmatprep.subr.bf16.mxu1 %v373_v37  ;;  %v377_v45 = vpack.c.bf16 %v134_v39, %v133_v38  ;;  %s428_s15 = smov [#allocation2]  }
  0x13   :  { %v50_v44 = vld [vmem:[%s628_s1 + $0xe0] sm:$0xff]  ;;  %v51_v46 = vld [vmem:[%s628_s1 + $0xe8] sm:$0xff]  ;;  %v135_v47 = vld [vmem:[%s629_s2 + $0x30] sm:$0xff]  ;;  %v359_v49 = vpack.c.bf16 %v33_v43, %v32_v42  ;;  %376 = vmatpush3.bf16.msra.mxu1 %v373_v37  ;;  %s234_s16 = sshll.u32 %s428_s15, 4  ;;  %s235_s16 = int_to_ptr.vmem [resolvable:$true] %s234_s16 }
  0x14   :  { %v136_v48 = vld [vmem:[%s629_s2 + $0x38] sm:$0xff]  ;;  %v361_v50 = vpack.c.bf16 %v51_v46, %v50_v44  ;;  %v34_v51 = vld [vmem:[%s628_s1 + $0x60] sm:$0xff]  ;;  %v35_v52 = vld [vmem:[%s628_s1 + $0x68] sm:$0xff]  ;;  %378 = vmatprep.subr.bf16.mxu1 %v377_v45  ;;  %p409_p1 = scmp.lt.s32.totalorder %s235_s16, %s235_s16 }
  0x15   :  { %356 = vmatpush3.bf16.msra.mxu0 %v355_v40  ;;  %v52_v53 = vld [vmem:[%s628_s1 + $0xf0] sm:$0xff]  ;;  %v381_v54 = vpack.c.bf16 %v136_v48, %v135_v47  ;;  %v53_v55 = vld [vmem:[%s628_s1 + $0xf8] sm:$0xff]  ;;  %v137_v56 = vld [vmem:[%s629_s2 + $0x40] sm:$0xff]  ;;  %v363_v58 = vpack.c.bf16 %v35_v52, %v34_v51 }
  0x16   :  { %358 = vmatprep.subr.bf16.mxu0 %v357_v41  ;;  %v138_v57 = vld [vmem:[%s629_s2 + $0x48] sm:$0xff]  ;;  %v365_v59 = vpack.c.bf16 %v53_v55, %v52_v53  ;;  %v36_v60 = vld [vmem:[%s628_s1 + $0x70] sm:$0xff]  ;;  %v37_v61 = vld [vmem:[%s628_s1 + $0x78] sm:$0xff] }
  0x17   :  { %380 = vmatpush3.bf16.msra.mxu1 %v377_v45  ;;  %v385_v62 = vpack.c.bf16 %v138_v57, %v137_v56  ;;  %v139_v63 = vld [vmem:[%s629_s2 + $0x50] sm:$0xff]  ;;  %v140_v0 = vld [vmem:[%s629_s2 + $0x58] sm:$0xff]  ;;  %v367_v1 = vpack.c.bf16 %v37_v61, %v36_v60  ;;  %v18_v3 = vld [vmem:[%s627_s0] sm:$0xff] }
  0x18   :  { %382 = vmatprep.subr.bf16.mxu1 %v381_v54  ;;  %v389_v2 = vpack.c.bf16 %v140_v0, %v139_v63  ;;  %v21_v4 = vld [vmem:[%s627_s0 + $0x18] sm:$0xff]  ;;  %v20_v5 = vld [vmem:[%s627_s0 + $0x10] sm:$0xff]  ;;  %v141_v6 = vld [vmem:[%s629_s2 + $0x60] sm:$0xff] }
  0x19   :  { %360 = vmatpush3.bf16.msra.mxu0 %v359_v49  ;;  %v142_v7 = vld [vmem:[%s629_s2 + $0x68] sm:$0xff]  ;;  %v143_v9 = vld [vmem:[%s629_s2 + $0x70] sm:$0xff]  ;;  %v144_v10 = vld [vmem:[%s629_s2 + $0x78] sm:$0xff]  ;;  %s404_s2 = scalar_lea.vmem %s235_s16, 256 }
  0x1a   :  { %362 = vmatprep.subr.bf16.mxu0 %v361_v50  ;;  %v393_v8 = vpack.c.bf16 %v142_v7, %v141_v6  ;;  %v397_v11 = vpack.c.bf16 %v144_v10, %v143_v9  ;;  %v245_v18 = vld [vmem:[%s630_s3] ss:$0 sm:$0xff]  ;;  %p405_p0 = scmp.ne.s32.totalorder %s235_s16, %s404_s2  ;;  %p410_p2 = scmp.lt.s32.totalorder %s404_s2, %s404_s2 }
  0x1b   :  { %384 = vmatpush3.bf16.msra.mxu1 %v381_v54 }
  0x1c   :  { %386 = vmatprep.subr.bf16.mxu1 %v385_v62  ;;  %p411_p3 = por %p410_p2, %p409_p1 }
  0x1d   :  { %364 = vmatpush3.bf16.msra.mxu0 %v363_v58 }
  0x1e   :  { %366 = vmatprep.subr.bf16.mxu0 %v365_v59  ;;  %p412_p4 = pnand %p411_p3, %p405_p0 }
  0x1f   :  { %388 = vmatpush3.bf16.msra.mxu1 %v385_v62 }
  0x20   :  { %390 = vmatprep.subr.bf16.mxu1 %v389_v2 }
  0x21   :  { %368 = vmatpush3.bf16.msra.mxu0 %v367_v1 }
  0x23   :  { %392 = vmatpush3.bf16.msra.mxu1 %v389_v2 }
  0x24   :  { %119 = vmatmul.mubr.f32.vlgmr.msra.gmra.mrb[0].mxu0 %v18_v3  ;;  %394 = vmatprep.subr.bf16.mxu1 %v393_v8 }
  0x25   :  { %123 = vmatprep.mubr.f32.mxu0 %v21_v4 }
  0x27   :  { %396 = vmatpush3.bf16.msra.mxu1 %v393_v8 }
  0x28   :  { %124 = vmatmul.mubr.f32.gmra.mrb[2].mxu0 %v20_v5  ;;  %398 = vmatprep.subr.bf16.mxu1 %v397_v11 }
  0x2b   :  { %400 = vmatpush3.bf16.msra.mxu1 %v397_v11 }
  0xf7   :  { %v278_v12 = vpop.f32.mrb[0].mxu0 }
  0xf8   :  { %v279_v13 = vpop.f32.mrb[1].mxu0 }
  0xf9   :  { %v280_v14 = vadd.f32 %v279_v13, %v278_v12 }
  0xfb   :  { %v281_v15 = vpop.f32.mrb[2].mxu0  ;;  %334 = vmatprep.mubr.f32.mxu1 %v280_v14 }
  0xfc   :  { %v282_v16 = vpop.f32.mrb[3].mxu0 }
  0xfd   :  { %v283_v17 = vadd.f32 %v282_v16, %v281_v15 }
  0xff   :  { %335 = vmatmul.mubr.f32.vlgmr.msra.gmra.mrb[0].mxu1 %v283_v17 }
 0x1d2   :  { %v336_v19 = vpop.f32.mrb[0].mxu1 }
 0x1d3   :  { %v224_v20 = vadd.f32 %v336_v19, %v245_v18  ;;  %v218_v21 = vpop.f32.mrb[1].mxu1 }
 0x1d4   :  { %v219_v22 = vadd.f32 %v245_v18, %v218_v21 }
 0x1d5   :  { %228 = vst [vmem:[#allocation2 + $0x8] sm:$0xff] %v224_v20 }
 0x1d6   :  { %227 = vst [vmem:[#allocation2] sm:$0xff] %v219_v22 }
 0x1d7   :  { %415 = shalt.err (!%p412_p4)
}
 0x1d8   :  { %s416_s3 = scalar_lea.hbm %s631_s4, 256 }
 0x1d9   :  { %p417_p5 = scmp.ne.s32.totalorder %s631_s4, %s416_s3  ;;  %p420_p6 = scmp.lt.u32.totalorder %s416_s3, %s631_s4 }
 0x1db   :  { %p422_p7 = pnand %p420_p6, %p417_p5 }
 0x1dd   :  { %425 = shalt.err (!%p422_p7)
}
 0x1de   :  { %s429_s23 = smov 128   ;;  %s430_s24 = smov 8  }
 0x1df   :  { %240 = dma.vmem_to_hbm [thread:$0]  %s235_s16, 256, %s631_s4, [#allocation3], %s429_s23, %s429_s23, %s430_s24  }
 0x1e0   :  { %426 = dma.done.wait [#allocation3], 256  }
 0x1e1   :  { %427 = vsyncadd [#allocation3], 4294967040 }
 0x1e2   :  { %244 = vsyncpa [#allocation3], 1 }

</bundles_post_ra>
